<compile_context>
chip_gen: v7x
topology: tpu7x:2x2x1
jax: 0.10.0
libtpu: 0.0.40
codegen_flags: <defaults>
</compile_context>

<pallas_src>
import jax
import jax.numpy as jnp
from jax.experimental import pallas as pl
from jax.experimental.pallas import tpu as pltpu

_LANE = 128


def _estimator_kernel(x_ref, mu_ref, mask_ref, tb_ref, wx_ref, wm_ref, o_ref):
    # Per-grid-step (b, ti) views:
    #   x_ref, mu_ref : (1, tT, Dp)  bf16
    #   mask_ref      : (1, tT, 1)   f32
    #   tb_ref        : (1, 1, Dp)   f32   (time conditioning + bias, per batch)
    #   wx_ref, wm_ref: (Dp, Dp)     bf16  (constant index_map -> stays resident)
    #   o_ref         : (1, tT, Dp)  f32
    x = x_ref[0]       # (tT, Dp)
    mu = mu_ref[0]     # (tT, Dp)

    h = jnp.dot(x, wx_ref[...], preferred_element_type=jnp.float32)
    h = h + jnp.dot(mu, wm_ref[...], preferred_element_type=jnp.float32)
    h = h + tb_ref[0]                      # (1, Dp) broadcast over rows, f32
    o_ref[0] = (h * mask_ref[0]).astype(o_ref.dtype)


def _round_up(n, m):
    return (n + m - 1) // m * m


def _pick_tile_t(T, Dp):
    # Keep double-buffered x/mu/out/mask stream blocks under ~16 MiB so the
    # pipeline stays double-buffered on every generation (incl. v7x 64 MiB VMEM).
    budget = 16 * 2**20
    per_row = 2 * (2 * Dp * 2 + Dp * 4 + 4)   # 2 bufs x (x+mu bf16, out f32, mask f32)
    t_max = max(8, budget // per_row)
    if T <= t_max:
        return T                              # one lane-/sublane-legal full block
    return int(t_max // 8 * 8)                # ragged last block handled by Pallas


def base_estimator_forward(x, mu, mu_mask, t, params):
    """x, mu: (B, T, D) f32; mu_mask: (B, T) f32/bool; t: (B,) f32 -> (B, T, D)."""
    B, T, D = x.shape
    wx, wm, wt, b = params["wx"], params["wm"], params["wt"], params["b"]
    Dt = wt.shape[0]

    # --- plain-JAX glue: sinusoidal timestep embedding + time/bias conditioning ---
    half = Dt // 2
    freqs = jnp.exp(-jnp.log(10000.0) * jnp.arange(half, dtype=jnp.float32) / half)
    angles = t.astype(jnp.float32)[:, None] * freqs[None, :]            # (B, half)
    temb = jnp.concatenate([jnp.sin(angles), jnp.cos(angles)], axis=-1)  # (B, Dt)
    # Hoisted out of the kernel: B*Dt*D flops total, done once.
    tbias = temb @ wt.astype(jnp.float32) + b.astype(jnp.float32)        # (B, D)

    # --- lane-dense feature dim (multiple of 128) + bf16 GEMM operands ---
    Dp = _round_up(D, _LANE)
    pad = Dp - D

    x_b = x.astype(jnp.bfloat16)
    mu_b = mu.astype(jnp.bfloat16)
    wx_b = wx.astype(jnp.bfloat16)
    wm_b = wm.astype(jnp.bfloat16)
    if pad:
        x_b = jnp.pad(x_b, ((0, 0), (0, 0), (0, pad)))
        mu_b = jnp.pad(mu_b, ((0, 0), (0, 0), (0, pad)))
        wx_b = jnp.pad(wx_b, ((0, pad), (0, pad)))
        wm_b = jnp.pad(wm_b, ((0, pad), (0, pad)))
        tbias = jnp.pad(tbias, ((0, 0), (0, pad)))
    tbias = tbias.reshape(B, 1, Dp).astype(jnp.float32)
    mask = mu_mask.astype(jnp.float32).reshape(B, T, 1)

    tT = _pick_tile_t(T, Dp)
    nT = pl.cdiv(T, tT)

    flops = 4 * B * T * Dp * Dp   # two (T,Dp)x(Dp,Dp) matmuls per batch
    bytes_accessed = (x_b.nbytes + mu_b.nbytes + mask.nbytes + tbias.nbytes
                      + wx_b.nbytes + wm_b.nbytes + B * T * Dp * 4)

    # NOTE: the weight BlockSpecs use a constant index_map, so Mosaic keeps them
    # resident across grid steps (no per-step re-DMA of Wx/Wm).
    out = pl.pallas_call(
        _estimator_kernel,
        out_shape=jax.ShapeDtypeStruct((B, T, Dp), jnp.float32),
        grid_spec=pltpu.PrefetchScalarGridSpec(
            num_scalar_prefetch=0,
            grid=(B, nT),
            in_specs=[
                pl.BlockSpec((1, tT, Dp), lambda bi, ti: (bi, ti, 0)),   # x (bf16)
                pl.BlockSpec((1, tT, Dp), lambda bi, ti: (bi, ti, 0)),   # mu (bf16)
                pl.BlockSpec((1, tT, 1), lambda bi, ti: (bi, ti, 0)),    # mask (f32)
                pl.BlockSpec((1, 1, Dp), lambda bi, ti: (bi, 0, 0)),     # time/bias (f32)
                pl.BlockSpec((Dp, Dp), lambda bi, ti: (0, 0)),           # Wx (bf16)
                pl.BlockSpec((Dp, Dp), lambda bi, ti: (0, 0)),           # Wm (bf16)
            ],
            out_specs=pl.BlockSpec((1, tT, Dp), lambda bi, ti: (bi, ti, 0)),
        ),
        compiler_params=pltpu.CompilerParams(
            dimension_semantics=("parallel", "parallel")),
        cost_estimate=pl.CostEstimate(
            flops=flops, transcendentals=0, bytes_accessed=bytes_accessed),
    )(x_b, mu_b, mask, tbias, wx_b, wm_b)

    if pad:
        out = out[..., :D]
    return out.astype(x.dtype)


def init_params(key, D, Dt):
    k1, k2, k3, k4 = jax.random.split(key, 4)
    scale = 1.0 / jnp.sqrt(D)
    return {
        "wx": jax.random.normal(k1, (D, D), jnp.float32) * scale,
        "wm": jax.random.normal(k2, (D, D), jnp.float32) * scale,
        "wt": jax.random.normal(k3, (Dt, D), jnp.float32) * (1.0 / jnp.sqrt(Dt)),
        "b":  jax.random.normal(k4, (D,), jnp.float32) * 0.01,
    }


if __name__ == "__main__":
    B, T, D, Dt = 2, 8, 32, 32
    key = jax.random.PRNGKey(0)
    kx, kmu, kt, kp = jax.random.split(key, 4)

    x = jax.random.normal(kx, (B, T, D), jnp.float32)        # noise
    mu = jax.random.normal(kmu, (B, T, D), jnp.float32)      # encoder output
    mu_mask = jnp.ones((B, T), jnp.float32).at[1, T // 2:].set(0.0)
    t = jax.random.uniform(kt, (B,), jnp.float32)             # timestep in [0,1)
    params = init_params(kp, D, Dt)

    out = base_estimator_forward(x, mu, mu_mask, t, params)
    jax.block_until_ready(out)

    # Pure-JAX reference at matching (bf16 GEMM-operand) precision.
    half = Dt // 2
    freqs = jnp.exp(-jnp.log(10000.0) * jnp.arange(half, dtype=jnp.float32) / half)
    ang = t[:, None] * freqs[None, :]
    temb = jnp.concatenate([jnp.sin(ang), jnp.cos(ang)], axis=-1)
    tbias = temb @ params["wt"] + params["b"]
    cast = lambda a: a.astype(jnp.bfloat16).astype(jnp.float32)
    ref = (cast(x) @ cast(params["wx"]) + cast(mu) @ cast(params["wm"])
           + tbias[:, None, :]) * mu_mask[..., None]
    assert jnp.allclose(out, ref, atol=1e-3, rtol=1e-3), float(jnp.max(jnp.abs(out - ref)))

    print("KERNEL_OK")
</pallas_src>

<mosaic_0001>
module attributes {stable_mosaic.version = 11 : i64} {
  func.func @_estimator_kernel(%arg0: i32, %arg1: i32, %arg2: memref<1x8x128xbf16, #tpu.memory_space<vmem>>, %arg3: memref<1x8x128xbf16, #tpu.memory_space<vmem>>, %arg4: memref<1x8x1xf32, #tpu.memory_space<vmem>>, %arg5: memref<1x1x128xf32, #tpu.memory_space<vmem>>, %arg6: memref<128x128xbf16, #tpu.memory_space<vmem>>, %arg7: memref<128x128xbf16, #tpu.memory_space<vmem>>, %arg8: memref<1x8x128xf32, #tpu.memory_space<vmem>>) attributes {dimension_semantics = [#tpu.dimension_semantics<parallel>, #tpu.dimension_semantics<parallel>], iteration_bounds = array<i64: 2, 1>, scalar_prefetch = 0 : i64, scratch_operands = 0 : i64, tpu.core_type = #tpu.core_type<tc>, window_params = [{transform_indices = @transform_0, window_bounds = array<i64: 1, 8, 128>}, {transform_indices = @transform_1, window_bounds = array<i64: 1, 8, 128>}, {transform_indices = @transform_2, window_bounds = array<i64: 1, 8, 1>}, {transform_indices = @transform_3, window_bounds = array<i64: 1, 1, 128>}, {pipeline_mode = #tpu.pipeline_mode<synchronous>, transform_indices = @transform_4, window_bounds = array<i64: 128, 128>}, {pipeline_mode = #tpu.pipeline_mode<synchronous>, transform_indices = @transform_5, window_bounds = array<i64: 128, 128>}, {transform_indices = @transform_6, window_bounds = array<i64: 1, 8, 128>}]} {
    %c0 = arith.constant 0 : index
    %c0_0 = arith.constant 0 : index
    %c0_1 = arith.constant 0 : index
    %0 = vector.load %arg2[%c0, %c0_0, %c0_1] : memref<1x8x128xbf16, #tpu.memory_space<vmem>>, vector<1x8x128xbf16>
    %1 = vector.shape_cast %0 : vector<1x8x128xbf16> to vector<8x128xbf16>
    %c0_2 = arith.constant 0 : index
    %c0_3 = arith.constant 0 : index
    %c0_4 = arith.constant 0 : index
    %2 = vector.load %arg3[%c0_2, %c0_3, %c0_4] : memref<1x8x128xbf16, #tpu.memory_space<vmem>>, vector<1x8x128xbf16>
    %3 = vector.shape_cast %2 : vector<1x8x128xbf16> to vector<8x128xbf16>
    %c0_5 = arith.constant 0 : index
    %c0_6 = arith.constant 0 : index
    %4 = vector.load %arg6[%c0_5, %c0_6] : memref<128x128xbf16, #tpu.memory_space<vmem>>, vector<128x128xbf16>
    %cst = arith.constant dense<0.000000e+00> : vector<8x128xf32>
    %5 = tpu.matmul %1, %4, %cst {dimension_numbers = #tpu.dot_dimension_numbers<[1], [0], [0], [1], [0, 0, 1, 1], [], []>} : vector<8x128xbf16>, vector<128x128xbf16>, vector<8x128xf32> -> vector<8x128xf32>
    %c0_7 = arith.constant 0 : index
    %c0_8 = arith.constant 0 : index
    %6 = vector.load %arg7[%c0_7, %c0_8] : memref<128x128xbf16, #tpu.memory_space<vmem>>, vector<128x128xbf16>
    %cst_9 = arith.constant dense<0.000000e+00> : vector<8x128xf32>
    %7 = tpu.matmul %3, %6, %cst_9 {dimension_numbers = #tpu.dot_dimension_numbers<[1], [0], [0], [1], [0, 0, 1, 1], [], []>} : vector<8x128xbf16>, vector<128x128xbf16>, vector<8x128xf32> -> vector<8x128xf32>
    %8 = arith.addf %5, %7 : vector<8x128xf32>
    %c0_10 = arith.constant 0 : index
    %c0_11 = arith.constant 0 : index
    %c0_12 = arith.constant 0 : index
    %9 = vector.load %arg5[%c0_10, %c0_11, %c0_12] : memref<1x1x128xf32, #tpu.memory_space<vmem>>, vector<1x1x128xf32>
    %10 = vector.shape_cast %9 : vector<1x1x128xf32> to vector<1x128xf32>
    %11 = vector.broadcast %10 : vector<1x128xf32> to vector<8x128xf32>
    %12 = arith.addf %8, %11 : vector<8x128xf32>
    %c0_13 = arith.constant 0 : index
    %c0_14 = arith.constant 0 : index
    %c0_15 = arith.constant 0 : index
    %13 = vector.load %arg4[%c0_13, %c0_14, %c0_15] : memref<1x8x1xf32, #tpu.memory_space<vmem>>, vector<1x8x1xf32>
    %14 = vector.shape_cast %13 : vector<1x8x1xf32> to vector<8x1xf32>
    %15 = vector.broadcast %14 : vector<8x1xf32> to vector<8x128xf32>
    %16 = arith.mulf %12, %15 : vector<8x128xf32>
    %c0_16 = arith.constant 0 : index
    %c0_17 = arith.constant 0 : index
    %c0_18 = arith.constant 0 : index
    %17 = vector.load %arg8[%c0_16, %c0_17, %c0_18] : memref<1x8x128xf32, #tpu.memory_space<vmem>>, vector<1x8x128xf32>
    %18 = vector.shape_cast %17 : vector<1x8x128xf32> to vector<8x128xf32>
    %19 = vector.shape_cast %16 : vector<8x128xf32> to vector<1x8x128xf32>
    tpu.vector_store %arg8[%c0_16, %c0_17, %c0_18], %19 {strides = array<i32>} : memref<1x8x128xf32, #tpu.memory_space<vmem>>, vector<1x8x128xf32>,
    return
  }
  func.func @transform_0(%arg0: i32, %arg1: i32) -> (i32, i32, i32) {
    %c0_i32 = arith.constant 0 : i32
    %c0_i32_0 = arith.constant 0 : i32
    return %arg0, %arg1, %c0_i32 : i32, i32, i32
  }
  func.func @transform_1(%arg0: i32, %arg1: i32) -> (i32, i32, i32) {
    %c0_i32 = arith.constant 0 : i32
    %c0_i32_0 = arith.constant 0 : i32
    return %arg0, %arg1, %c0_i32 : i32, i32, i32
  }
  func.func @transform_2(%arg0: i32, %arg1: i32) -> (i32, i32, i32) {
    %c0_i32 = arith.constant 0 : i32
    %c0_i32_0 = arith.constant 0 : i32
    return %arg0, %arg1, %c0_i32 : i32, i32, i32
  }
  func.func @transform_3(%arg0: i32, %arg1: i32) -> (i32, i32, i32) {
    %c0_i32 = arith.constant 0 : i32
    %c0_i32_0 = arith.constant 0 : i32
    %c0_i32_1 = arith.constant 0 : i32
    return %arg0, %c0_i32, %c0_i32_0 : i32, i32, i32
  }
  func.func @transform_4(%arg0: i32, %arg1: i32) -> (i32, i32) {
    %c0_i32 = arith.constant 0 : i32
    %c0_i32_0 = arith.constant 0 : i32
    %c0_i32_1 = arith.constant 0 : i32
    return %c0_i32, %c0_i32_0 : i32, i32
  }
  func.func @transform_5(%arg0: i32, %arg1: i32) -> (i32, i32) {
    %c0_i32 = arith.constant 0 : i32
    %c0_i32_0 = arith.constant 0 : i32
    %c0_i32_1 = arith.constant 0 : i32
    return %c0_i32, %c0_i32_0 : i32, i32
  }
  func.func @transform_6(%arg0: i32, %arg1: i32) -> (i32, i32, i32) {
    %c0_i32 = arith.constant 0 : i32
    %c0_i32_0 = arith.constant 0 : i32
    return %arg0, %arg1, %c0_i32 : i32, i32, i32
  }
}

</mosaic_0001>

<bundles_post_ra>
// kernel: tpu_custom_call.1
= control target key start
LH: loop header
LB: loop body
LE: loop exit
PB: predicated region body
PF: predicated region fallthrough
CT: control target
= control target key end

     0   :  { %11 = vsyncpa [#allocation3], 0  ;;  %s1324_s0 = inlined_call_operand.vmem [shape: bf16[2,8,128], index: 0, kind: input, shape index: {}]   ;;  %s1325_s1 = inlined_call_operand.vmem [shape: bf16[2,8,128], index: 1, kind: input, shape index: {}]   ;;  %s1326_s2 = inlined_call_operand.vmem [shape: f32[2,8,1], index: 2, kind: input, shape index: {}]   ;;  %s1327_s3 = inlined_call_operand.vmem [shape: f32[2,1,128], index: 3, kind: input, shape index: {}]   ;;  %s1328_s4 = inlined_call_operand.hbm [shape: bf16[128,128], index: 4, kind: input, shape index: {}]   ;;  %s1329_s5 = inlined_call_operand.hbm [shape: bf16[128,128], index: 5, kind: input, shape index: {}]   ;;  %s1330_s6 = inlined_call_operand.hbm [shape: f32[2,8,128], index: 6, kind: output, shape index: {}]  }
   0x1   :  { %12 = vsyncpa [#allocation6], 0 }
   0x2   :  { %13 = vsyncpa [#allocation4], 0 }
   0x3   :  { %15 = vsyncpa [#allocation4 + $0x1], 0  ;;  %s1123_s21 = smov 0   ;;  %s1125_s22 = smov 0  }
   0x4   :  { %s1127_s23 = smov 0   ;;  %s1129_s24 = smov 0  }
   0x5   :  { %s1131_s25 = smov 0   ;;  %s1133_s26 = smov 0  }
   0x6 LB: > { %1337 = sst [smem:[#allocation11_spill]] %s1074_s25  ;;  %s746_s27 = sadd.s32 4294967295, %s1078_s26   ;;  %s1078_s26 = sphi %s1133_s26, %s21_s26   ;;  %s1074_s25 = sphi %s1131_s25, %s1349_s25   ;;  %s1070_s24 = sphi %s1129_s24, %s1348_s24   ;;  %s1066_s23 = sphi %s1127_s23, %s1352_s23   ;;  %s1062_s22 = sphi %s1125_s22, %s1351_s22   ;;  %s1058_s21 = sphi %s1123_s21, %s1350_s21  }
   0x7   : > { %s747_s28 = sadd.s32 4294967294, %s1078_s26   ;;  %s33_s29 = sadd.s32 1, %s1074_s25 }
   0x8   : > { %s194_s30 = sadd.s32 1, %s1066_s23  ;;  %p35_p0 = scmp.ge.s32.totalorder %s33_s29, 2 }
   0x9   : > { %p204_p1 = scmp.ne.s32.totalorder %s1066_s23, %s1062_s22  ;;  %p205_p2 = scmp.eq.s32.totalorder %s746_s27, 1 }
   0xa   : > { %p210_p3 = scmp.ne.s32.totalorder %s1062_s22, %s1058_s21  ;;  %s1354_s29 = smov (%p35_p0, %s33_s29), 0 }
   0xb   : > { %1338 = sst [smem:[#allocation12_spill]] %s1354_s29  ;;  %p1163_p4 = por %p205_p2, %p204_p1 }
   0xc   : > { %p211_p5 = scmp.eq.s32.totalorder %s747_s28, 1  ;;  %s189_s8 = ssub.s32 %s1074_s25, %s1354_s29 }
   0xd   : > { %s1339_s7 = scalar_select %p1163_p4, 1, 0 }
   0xe   : > { %p748_p6 = scmp.ge.s32.totalorder %s1078_s26, 1  ;;  %p192_p7 = scmp.eq.s32.totalorder %s189_s8, 0 }
   0xf   : > { %p1170_p8 = por %p211_p5, %p210_p3  ;;  %p218_p9 = scmp.lt.s32.totalorder %s1078_s26, 3 }
  0x10   : > { %s1176_s10 = scalar_select %p192_p7, %s1066_s23, %s194_s30  }
  0x11   : > { %s1340_s9 = scalar_select %p1170_p8, 1, 0 }
  0x12   : > { %p1178_p10 = pnand %p748_p6, %p218_p9  ;;  %p1182_p11 = scmp.eq.s32.totalorder %s746_s27, 0 }
  0x13   : > { %s1080_s13 = smov [#allocation2]   ;;  %s1081_s16 = smov [#allocation5]  }
  0x14   : > { %s1341_s11 = scalar_select %p1178_p10, 1, 0 }
  0x15   : > { %s1342_s12 = scalar_select %p1182_p11, 1, 0 }
  0x16   : > { %p848_p12 = pneg %p1178_p10  ;;  %s230_s14 = sshll.u32 %s1080_s13, 4  ;;  %s231_s14 = int_to_ptr.vmem [resolvable:$true] %s230_s14 }
  0x17   : > { %s243_s17 = sshll.u32 %s1081_s16, 4  ;;  %s936_s20 = scalar_lea.hbm %s1328_s4, 1024  ;;  %s1194_s17 = int_to_ptr.vmem [resolvable:$true] %s243_s17 }
  0x18   : > { %p1190_p13 = pnand %p1182_p11, %p848_p12  ;;  %p937_p0 = scmp.ne.s32.totalorder %s1328_s4, %s936_s20 }
  0x19   : > { %p943_p5 = scmp.lt.u32.totalorder %s936_s20, %s1328_s4 }
  0x1a   : > { %p938_p1 = pneg %p1190_p13 }
  0x1c   : > { %p939_p2 = pnand %p938_p1, %p937_p0 }
  0x1e   : > { %p940_p3 = pneg %p939_p2 }
  0x20   : > { %p945_p6 = pnand %p943_p5, %p940_p3 }
  0x22   : > { %948 = shalt.err (!%p945_p6)
}
  0x23   : > { %s949_s13 = scalar_lea.vmem %s231_s14, 1024  ;;  %p957_p8 = scmp.lt.s32.totalorder %s231_s14, %s231_s14 }
  0x24   : > { %p950_p7 = scmp.ne.s32.totalorder %s231_s14, %s949_s13  ;;  %p958_p4 = scmp.lt.s32.totalorder %s949_s13, %s949_s13 }
  0x26   : > { %p952_p9 = pnand %p950_p7, %p938_p1  ;;  %p959_p11 = por %p958_p4, %p957_p8 }
  0x28   : > { %p953_p12 = pneg %p952_p9 }
  0x2a   : > { %p960_p10 = pnand %p959_p11, %p953_p12 }
  0x2c   : > { %963 = shalt.err (!%p960_p10)
}
  0x2d   : > { %s1082_s16 = smov 64   ;;  %s1083_s18 = smov 4  }
  0x2e   : > { %851 = dma.hbm_to_vmem [thread:$0]  (!%p1190_p13), %s1328_s4, 1024, %s231_s14, [#allocation3], %s1082_s16, %s1082_s16, %s1083_s18  }
  0x2f   : > { %s964_s30 = scalar_lea.hbm %s1329_s5, 1024 }
  0x30   : > { %p965_p0 = scmp.ne.s32.totalorder %s1329_s5, %s964_s30  ;;  %p971_p10 = scmp.lt.u32.totalorder %s964_s30, %s1329_s5 }
  0x32   : > { %p967_p4 = pnand %p965_p0, %p938_p1 }
  0x34   : > { %p968_p8 = pneg %p967_p4 }
  0x36   : > { %p973_p11 = pnand %p971_p10, %p968_p8 }
  0x38   : > { %976 = shalt.err (!%p973_p11)
}
  0x39   : > { %s977_s14 = scalar_lea.vmem %s1194_s17, 1024  ;;  %p985_p6 = scmp.lt.s32.totalorder %s1194_s17, %s1194_s17 }
  0x3a   : > { %p978_p2 = scmp.ne.s32.totalorder %s1194_s17, %s977_s14  ;;  %p986_p7 = scmp.lt.s32.totalorder %s977_s14, %s977_s14 }
  0x3c   : > { %p980_p3 = pnand %p978_p2, %p938_p1  ;;  %p987_p9 = por %p986_p7, %p985_p6 }
  0x3e   : > { %p981_p5 = pneg %p980_p3 }
  0x40   : > { %p988_p12 = pnand %p987_p9, %p981_p5 }
  0x42   : > { %991 = shalt.err (!%p988_p12)
}
  0x43   : > { %854 = dma.hbm_to_vmem [thread:$0]  (!%p1190_p13), %s1329_s5, 1024, %s1194_s17, [#allocation6], %s1082_s16, %s1082_s16, %s1083_s18  }
  0x44   : > { %p1344_p0 = scmp.ne.s32.totalorder %s1341_s11, 0 }
  0x45   : > { %p1345_p4 = scmp.ne.s32.totalorder (!%p1344_p0), %s1342_s12, 0 }
  0x46   : > { %295 = sbr.rel (%p1344_p0) target bundleno = 347 (0x15b), region = 44 }
  0x4d   : > { %1045 = dma.done.wait (%p1345_p4), [#allocation3], 1024  }
  0x4e   : > { %1047 = vsyncadd (%p1345_p4), [#allocation3], 4294966272 }
  0x4f   : > { %1049 = dma.done.wait (%p1345_p4), [#allocation6], 1024  }
  0x50   : > { %1051 = vsyncadd (%p1345_p4), [#allocation6], 4294966272  ;;  %v1084_v0 = vmov 0.0   ;;  %vm1085_vm0 = vmmov 0   ;;  %v1086_v1 = vmov 0   ;;  %v920_v2 = vld [vmem:[#allocation5] sm:$0xff]  }
  0x51   : > { %798 = vmatprep.subr.bf16.mxu0 %v1084_v0  ;;  %818 = vmatprep.subr.bf16.mxu1 %v1084_v0  ;;  %v921_v3 = vld [vmem:[#allocation2] sm:$0xff]   ;;  %v922_v4 = vld [vmem:[#allocation5 + $0x8] sm:$0xff]   ;;  %p348_p13 = scmp.lt.s32.totalorder %s1070_s24, 1  ;;  %v924_v6 = vld [vmem:[#allocation5 + $0x10] sm:$0xff]   ;;  %s345_s13 = sand.u32 1, %s1062_s22  }
  0x52   : > { %814 = vmatprep.mubr.msk.bf16.mxu0 %vm1085_vm0, %v1084_v0  ;;  %834 = vmatprep.mubr.msk.bf16.mxu1 %vm1085_vm0, %v1084_v0  ;;  %v923_v5 = vld [vmem:[#allocation2 + $0x8] sm:$0xff]   ;;  %v925_v7 = vld [vmem:[#allocation2 + $0x10] sm:$0xff]   ;;  %v926_v8 = vld [vmem:[#allocation5 + $0x18] sm:$0xff]   ;;  %s755_s14 = sshll.u32 %s345_s13, 3  ;;  %s777_s15 = sshll.u32 %s1070_s24, 7 }
  0x53   : > { %919 = vset.pattern.permute.xlu0 %v1086_v1  ;;  %799 = vmatpush3.bf16.msra.mxu0 %v920_v2  ;;  %s1255_s11 = scalar_select %p348_p13, %s1070_s24, 1  ;;  %v927_v9 = vld [vmem:[#allocation2 + $0x18] sm:$0xff]   ;;  %v928_v10 = vld [vmem:[#allocation5 + $0x20] sm:$0xff]   ;;  %v930_v13 = vld [vmem:[#allocation5 + $0x28] sm:$0xff]  }
  0x54   : > { %819 = vmatpush3.bf16.msra.mxu1 %v921_v3  ;;  %800 = vmatprep.subr.bf16.mxu0 %v1084_v0  ;;  %v929_v11 = vld [vmem:[#allocation2 + $0x20] sm:$0xff]   ;;  %v931_v14 = vld [vmem:[#allocation2 + $0x28] sm:$0xff]   ;;  %v932_v15 = vld [vmem:[#allocation5 + $0x30] sm:$0xff]   ;;  %s347_s17 = scalar_lea.vmem [#allocation7], %s755_s14  ;;  %s600_s20 = scalar_lea.sflag [#allocation4], %s345_s13 }
  0x55   : > { %820 = vmatprep.subr.bf16.mxu1 %v1084_v0  ;;  %s758_s12 = sshll.u32 %s1255_s11, 3  ;;  %v933_v16 = vld [vmem:[#allocation2 + $0x30] sm:$0xff]   ;;  %s756_s18 = sshll.u32 %s1255_s11, 2  ;;  %v934_v17 = vld [vmem:[#allocation5 + $0x38] sm:$0xff]  }
  0x56   : > { %s368_s16 = scalar_lea.vmem %s1326_s2, %s758_s12  ;;  %v935_v18 = vld [vmem:[#allocation2 + $0x38] sm:$0xff]   ;;  %s361_s27 = scalar_lea.vmem %s1325_s1, %s756_s18 }
  0x57   : > { %801 = vmatpush3.bf16.msra.mxu0 %v922_v4  ;;  %v591_v12 = vld [vmem:[%s368_s16] sm:$0xff]  ;;  %s354_s8 = scalar_lea.vmem %s1324_s0, %s756_s18  ;;  %s371_s12 = scalar_lea.vmem %s1327_s3, %s1255_s11 }
  0x58   : > { %821 = vmatpush3.bf16.msra.mxu1 %v923_v5  ;;  %802 = vmatprep.subr.bf16.mxu0 %v1084_v0  ;;  %v374_v19 = vld [vmem:[%s361_s27] sm:$0xf]  ;;  %s614_s16 = sshll.u32 %s347_s17, 4  ;;  %s1277_s11 = scalar_lea.hbm %s1330_s6, %s777_s15  ;;  %s1279_s16 = int_to_ptr.vmem [resolvable:$true] %s614_s16 }
  0x59   : > { %822 = vmatprep.subr.bf16.mxu1 %v1084_v0  ;;  %594 = vperm.xlu0 %919, %v591_v12   ;;  %v373_v20 = vld [vmem:[%s354_s8] sm:$0xf]  ;;  %s992_s27 = scalar_lea.vmem %s1279_s16, 128  ;;  %p1346_p8 = scmp.ne.s32.totalorder %s1339_s7, 0 }
  0x5a   : > { %v775_v25 = vld [vmem:[%s371_s12] ss:$0 sm:$0xff]  ;;  %p993_p1 = scmp.ne.s32.totalorder %s1279_s16, %s992_s27  ;;  %s1087_s24 = smov [#allocation7]  }
  0x5b   : > { %803 = vmatpush3.bf16.msra.mxu0 %v924_v6  ;;  %s996_s28 = sshll.u32 %s1087_s24, 4  ;;  %s997_s28 = int_to_ptr.vmem [resolvable:$false] %s996_s28 }
  0x5c   : > { %823 = vmatpush3.bf16.msra.mxu1 %v925_v7  ;;  %804 = vmatprep.subr.bf16.mxu0 %v1084_v0  ;;  %p994_p10 = pnand %p993_p1, %p1346_p8  ;;  %s998_s30 = scalar_lea.vmem %s997_s28, 256 }
  0x5d   : > { %824 = vmatprep.subr.bf16.mxu1 %v1084_v0  ;;  %p999_p2 = scmp.lt.s32.totalorder %s1279_s16, %s997_s28  ;;  %p1000_p3 = scmp.lt.s32.totalorder %s998_s30, %s992_s27 }
  0x5e   : > { %p995_p11 = pneg %p994_p10 }
  0x5f   : > { %805 = vmatpush3.bf16.msra.mxu0 %v926_v8  ;;  %p1001_p5 = por %p1000_p3, %p999_p2 }
  0x60   : > { %825 = vmatpush3.bf16.msra.mxu1 %v927_v9  ;;  %806 = vmatprep.subr.bf16.mxu0 %v1084_v0 }
  0x61   : > { %826 = vmatprep.subr.bf16.mxu1 %v1084_v0  ;;  %p1002_p6 = pnand %p1001_p5, %p995_p11 }
  0x63   : > { %807 = vmatpush3.bf16.msra.mxu0 %v928_v10 }
  0x64   : > { %827 = vmatpush3.bf16.msra.mxu1 %v929_v11  ;;  %808 = vmatprep.subr.bf16.mxu0 %v1084_v0 }
  0x65   : > { %828 = vmatprep.subr.bf16.mxu1 %v1084_v0 }
  0x67   : > { %809 = vmatpush3.bf16.msra.mxu0 %v930_v13 }
  0x68   : > { %829 = vmatpush3.bf16.msra.mxu1 %v931_v14  ;;  %810 = vmatprep.subr.bf16.mxu0 %v1084_v0 }
  0x69   : > { %830 = vmatprep.subr.bf16.mxu1 %v1084_v0 }
  0x6b   : > { %811 = vmatpush3.bf16.msra.mxu0 %v932_v15 }
  0x6c   : > { %831 = vmatpush3.bf16.msra.mxu1 %v933_v16  ;;  %812 = vmatprep.subr.bf16.mxu0 %v1084_v0 }
  0x6d   : > { %832 = vmatprep.subr.bf16.mxu1 %v1084_v0 }
  0x6f   : > { %813 = vmatpush3.bf16.msra.mxu0 %v934_v17 }
  0x70   : > { %833 = vmatpush3.bf16.msra.mxu1 %v935_v18 }
  0x72   : > { %815 = vmatmul.mubr.bf16.vlgmr.msra.gmra.mrb[0].mxu0 %v374_v19 }
  0x73   : > { %835 = vmatmul.mubr.bf16.vlgmr.msra.gmra.mrb[0].mxu1 %v373_v20 }
  0xd8   : > { %v595_v22 = vpop.permute.xlu0 %594 }
 0x145   : > { %v489_v21 = vpop.f32.mrb[0].mxu0 }
 0x146   : > { %v577_v23 = vpop.f32.mrb[0].mxu1  ;;  %v816_v24 = vpop.f32.mrb[1].mxu0 }
 0x147   : > { %v578_v26 = vadd.f32 %v577_v23, %v489_v21  ;;  %v836_v27 = vpop.f32.mrb[1].mxu1  ;;  %v492_v28 = vpop.f32.mrb[2].mxu0 }
 0x148   : > { %v580_v29 = vpop.f32.mrb[2].mxu1  ;;  %v817_v30 = vpop.f32.mrb[3].mxu0 }
 0x149   : > { %v837_v31 = vpop.f32.mrb[3].mxu1  ;;  %v590_v32 = vadd.f32 %v775_v25, %v578_v26 }
 0x14b   : > { %v597_v33 = vmul.f32 %v595_v22, %v590_v32 }
 0x14d   : > { %598 = vst [vmem:[%s347_s17] sm:$0xff] %v597_v33 }
 0x14e   : > { %1005 = shalt.err (!%p1002_p6)
}
 0x14f   : > { %s1006_s8 = scalar_lea.hbm %s1277_s11, 128  ;;  %s1010_s25 = scalar_lea.hbm %s1330_s6, 256 }
 0x150   : > { %p1007_p7 = scmp.ne.s32.totalorder %s1277_s11, %s1006_s8  ;;  %p1011_p0 = scmp.lt.u32.totalorder %s1277_s11, %s1330_s6 }
 0x151   : > { %p1012_p4 = scmp.lt.u32.totalorder %s1010_s25, %s1006_s8  ;;  %p1014_p1 = scmp.lt.u32.totalorder %s1006_s8, %s1277_s11 }
 0x152   : > { %p1008_p9 = pnand %p1007_p7, %p1346_p8 }
 0x153   : > { %p1013_p13 = por %p1012_p4, %p1011_p0 }
 0x154   : > { %p1009_p12 = pneg %p1008_p9 }
 0x155   : > { %p1015_p10 = por %p1014_p1, %p1013_p13 }
 0x157   : > { %p1016_p11 = pnand %p1015_p10, %p1009_p12 }
 0x159   : > { %1019 = shalt.err (!%p1016_p11)
}
 0x15a   : > { %846 = dma.vmem_to_hbm [thread:$0]  (%p1346_p8), %s1279_s16, 128, %s1277_s11, %s600_s20  }
 0x15b PF: > { %p863_p2 = scmp.ge.s32.totalorder %s1078_s26, 2  ;;  %s626_s15 = sand.u32 1, %s1058_s21  }
 0x15c   : > { %p1347_p3 = scmp.ne.s32.totalorder %s1340_s9, 0  ;;  %s627_s17 = scalar_lea.sflag [#allocation4], %s626_s15 }
 0x15e   : > { %p856_p5 = pnand %p863_p2, %p1347_p3 }
 0x160   : > { %1053 = dma.done.wait (!%p856_p5), %s627_s17, 128  }
 0x161   : > { %1055 = vsyncadd (!%p856_p5), %s627_s17, 4294967168  ;;  %s21_s26 = sadd.s32 1, %s1078_s26   ;;  %s1348_s24 = sld [smem:[#allocation11_spill]] }
 0x162   : > { %p18_p6 = scmp.ge.s32.totalorder %s21_s26, 4   ;;  %s1349_s25 = sld [smem:[#allocation12_spill]] }
 0x163   : > { %s1350_s21 = smov %s1062_s22  ;;  %s1351_s22 = smov %s1066_s23 }
 0x164   : > { %s1352_s23 = smov %s1176_s10  ;;  %20 = sbr.rel (!%p18_p6) target bundleno = 6 (0x6), region = 97 }
 0x16b   :  { %632 = vsyncpa [#allocation3], 1 }
 0x16c   :  { %634 = vsyncpa [#allocation3 + $0x1], 1 }
 0x16d   :  { %635 = vsyncpa [#allocation6], 1 }
 0x16e   :  { %636 = vsyncpa [#allocation4], 1 }
 0x16f   :  { %638 = vsyncpa [#allocation4 + $0x1], 1 }

</bundles_post_ra>
